<compile_context>
chip_gen: v5e
topology: v5e:2x2
jax: 0.10.0
libtpu: 0.0.40
codegen_flags: <defaults>
</compile_context>

<pallas_src>
import jax
import jax.numpy as jnp
from jax.experimental import pallas as pl
from jax.experimental.pallas import tpu as pltpu


def _pick_tile(dim, target, align):
    """Largest multiple of `align` <= target that divides `dim`; else full dim."""
    t = (min(target, dim) // align) * align
    while t >= align:
        if dim % t == 0:
            return t
        t -= align
    return dim


def residual_linear(x, w, b, *, tm=1024, tn=512, tk=1024):
    """Residual(Linear)(x) = x @ w + b + x via a tiled Pallas TPU kernel.

    x: (B, S, H)   w: (H, H)   b: (H,)
    """
    B, S, H = x.shape
    M = B * S

    # bf16 inputs feed the MXU at full rate on v5e/v6e/v7x; accumulation and
    # the bias/residual epilogue stay in f32 inside the kernel.
    x2 = x.reshape(M, H).astype(jnp.bfloat16)
    w2 = w.astype(jnp.bfloat16)
    b2 = b.reshape(1, H).astype(jnp.bfloat16)

    # Row tile: streamed & double-buffered; trailing partial row-blocks are fine
    # (row-local compute, masked writeback).
    TM = min(tm, M)
    # Column / contraction tiles must divide H exactly (contraction padding
    # would pollute valid outputs). TN is 128-lane aligned; TK is a multiple of
    # TN so the residual columns of output block j live inside one x tile.
    TN = _pick_tile(H, tn, 128)
    TK = _pick_tile(H, max(tk, TN), TN)
    assert H % TN == 0 and H % TK == 0 and TK % TN == 0

    # v7x shards the "parallel" grid axes across its 2 TensorCores; make sure
    # there are >= 2 independent (i, j) tiles when the shape allows it.
    if pl.cdiv(M, TM) * (H // TN) < 2 and TM >= 32:
        TM = max(16, ((TM // 2 + 15) // 16) * 16)

    grid = (pl.cdiv(M, TM), H // TN, H // TK)

    def kernel(x_ref, w_ref, b_ref, o_ref, acc_ref):
        j = pl.program_id(1)
        k = pl.program_id(2)

        prod = jnp.dot(x_ref[...], w_ref[...], preferred_element_type=jnp.float32)

        # No zero-fill pass: first K-step overwrites, later steps accumulate.
        @pl.when(k == 0)
        def _first():
            acc_ref[...] = prod

        @pl.when(k != 0)
        def _accum():
            acc_ref[...] += prod

        # Residual add: columns [j*TN, (j+1)*TN) of x sit inside the x tile of
        # K-step (j*TN)//TK; add them into the accumulator exactly once.
        if TK == TN:
            @pl.when(k == j)
            def _residual():
                acc_ref[...] += x_ref[...].astype(jnp.float32)
        else:
            k_match = (j * TN) // TK

            @pl.when(k == k_match)
            def _residual():
                off = pl.multiple_of(j * TN - k_match * TK, TN)
                acc_ref[...] += x_ref[:, pl.ds(off, TN)].astype(jnp.float32)

        @pl.when(k == pl.num_programs(2) - 1)
        def _finalize():
            # bias broadcast over rows, single lane-dense store.
            y = acc_ref[...] + b_ref[...].astype(jnp.float32)
            o_ref[...] = y.astype(o_ref.dtype)

    # VMEM plan: double-buffered bf16 input tiles + double-buffered output tile
    # + f32 accumulator, with 2x headroom for compiler scratch, capped at
    # 48 MiB (fits v7x's 64 MiB/TC; lifts v5e's 16 MiB default scoped cap).
    plan_bytes = (
        2 * (TM * TK + TK * TN + TN) * 2          # bf16 inputs, 2-deep pipeline
        + 2 * TM * TN * x.dtype.itemsize          # output tile, 2-deep
        + TM * TN * 4                             # f32 accumulator
    )
    vmem_limit = min(48 * 1024 * 1024, max(32 * 1024 * 1024, 2 * plan_bytes))

    out2 = pl.pallas_call(
        kernel,
        out_shape=jax.ShapeDtypeStruct((M, H), x.dtype),
        grid_spec=pltpu.PrefetchScalarGridSpec(
            num_scalar_prefetch=0,
            grid=grid,
            in_specs=[
                # x tile (row-block i, K-block k): feeds the MXU and supplies
                # the residual columns for output block j.
                pl.BlockSpec((TM, TK), lambda i, j, k: (i, k)),
                # weight tile (K-block k, N-block j): re-streamed per (i, k),
                # so larger TM directly cuts weight HBM traffic.
                pl.BlockSpec((TK, TN), lambda i, j, k: (k, j)),
                # bias tile (N-block j): resident across the K loop.
                pl.BlockSpec((1, TN), lambda i, j, k: (0, j)),
            ],
            out_specs=pl.BlockSpec((TM, TN), lambda i, j, k: (i, j)),
            scratch_shapes=[pltpu.VMEM((TM, TN), jnp.float32)],
        ),
        compiler_params=pltpu.CompilerParams(
            # M and N tiles are independent -> shardable across v7x's 2 TCs;
            # K is the reduction -> serial.
            dimension_semantics=("parallel", "parallel", "arbitrary"),
            vmem_limit_bytes=vmem_limit,
        ),
    )(x2, w2, b2)

    return out2.reshape(B, S, H)


if __name__ == "__main__":
    key = jax.random.PRNGKey(0)
    kx, kw, kb = jax.random.split(key, 3)

    # Small demo shapes; hidden=128 keeps the output lane-dense (128-lane axis).
    B, S, H = 2, 8, 128
    x = jax.random.normal(kx, (B, S, H), dtype=jnp.float32)
    # Deterministic "fn" parameters (Linear(H, H)).
    w = jax.random.normal(kw, (H, H), dtype=jnp.float32) * 0.05
    b = jax.random.normal(kb, (H,), dtype=jnp.float32) * 0.05

    out = residual_linear(x, w, b)
    jax.block_until_ready(out)

    # Reference: fn(x) + x with the same bf16-quantized inputs the kernel sees
    # (the kernel accumulates in f32, so only input rounding differs).
    xb = x.astype(jnp.bfloat16).astype(jnp.float32)
    wb = w.astype(jnp.bfloat16).astype(jnp.float32)
    bb = b.astype(jnp.bfloat16).astype(jnp.float32)
    ref = jnp.einsum("bsh,hk->bsk", xb, wb) + bb + xb

    assert out.shape == x.shape and out.dtype == x.dtype
    assert jnp.allclose(out, ref, atol=1e-2, rtol=1e-2), "mismatch vs reference"

    print("KERNEL_OK")
</pallas_src>

<mosaic_0001>
module attributes {stable_mosaic.version = 11 : i64} {
  func.func @kernel(%arg0: i32, %arg1: i32, %arg2: i32, %arg3: memref<16x128xbf16, #tpu.memory_space<vmem>>, %arg4: memref<128x128xbf16, #tpu.memory_space<vmem>>, %arg5: memref<1x128xbf16, #tpu.memory_space<vmem>>, %arg6: memref<16x128xf32, #tpu.memory_space<vmem>>, %arg7: memref<16x128xf32, #tpu.memory_space<vmem>>) attributes {dimension_semantics = [#tpu.dimension_semantics<parallel>, #tpu.dimension_semantics<parallel>, #tpu.dimension_semantics<arbitrary>], iteration_bounds = array<i64: 1, 1, 1>, scalar_prefetch = 0 : i64, scratch_operands = 1 : i64, tpu.core_type = #tpu.core_type<tc>, window_params = [{transform_indices = @transform_0, window_bounds = array<i64: 16, 128>}, {transform_indices = @transform_1, window_bounds = array<i64: 128, 128>}, {transform_indices = @transform_2, window_bounds = array<i64: 1, 128>}, {transform_indices = @transform_3, window_bounds = array<i64: 16, 128>}]} {
    %c0 = arith.constant 0 : index
    %c0_0 = arith.constant 0 : index
    %0 = vector.load %arg3[%c0, %c0_0] : memref<16x128xbf16, #tpu.memory_space<vmem>>, vector<16x128xbf16>
    %c0_1 = arith.constant 0 : index
    %c0_2 = arith.constant 0 : index
    %1 = vector.load %arg4[%c0_1, %c0_2] : memref<128x128xbf16, #tpu.memory_space<vmem>>, vector<128x128xbf16>
    %cst = arith.constant dense<0.000000e+00> : vector<16x128xf32>
    %2 = tpu.matmul %0, %1, %cst {dimension_numbers = #tpu.dot_dimension_numbers<[1], [0], [0], [1], [0, 0, 1, 1], [], []>} : vector<16x128xbf16>, vector<128x128xbf16>, vector<16x128xf32> -> vector<16x128xf32>
    %c0_i32 = arith.constant 0 : i32
    %3 = arith.cmpi eq, %arg2, %c0_i32 : i32
    %4 = arith.extui %3 : i1 to i32
    %c0_i32_3 = arith.constant 0 : i32
    %5 = arith.cmpi ne, %4, %c0_i32_3 : i32
    scf.if %5 {
      %c0_9 = arith.constant 0 : index
      %c0_10 = arith.constant 0 : index
      %15 = vector.load %arg7[%c0_9, %c0_10] : memref<16x128xf32, #tpu.memory_space<vmem>>, vector<16x128xf32>
      tpu.vector_store %arg7[%c0_9, %c0_10], %2 {strides = array<i32>} : memref<16x128xf32, #tpu.memory_space<vmem>>, vector<16x128xf32>,
    } else {
    }
    %c0_i32_4 = arith.constant 0 : i32
    %6 = arith.cmpi ne, %arg2, %c0_i32_4 : i32
    %7 = arith.extui %6 : i1 to i32
    %c0_i32_5 = arith.constant 0 : i32
    %8 = arith.cmpi ne, %7, %c0_i32_5 : i32
    scf.if %8 {
      %c0_9 = arith.constant 0 : index
      %c0_10 = arith.constant 0 : index
      %15 = vector.load %arg7[%c0_9, %c0_10] : memref<16x128xf32, #tpu.memory_space<vmem>>, vector<16x128xf32>
      %16 = arith.addf %15, %2 : vector<16x128xf32>
      %c0_11 = arith.constant 0 : index
      %c0_12 = arith.constant 0 : index
      %17 = vector.load %arg7[%c0_11, %c0_12] : memref<16x128xf32, #tpu.memory_space<vmem>>, vector<16x128xf32>
      tpu.vector_store %arg7[%c0_11, %c0_12], %16 {strides = array<i32>} : memref<16x128xf32, #tpu.memory_space<vmem>>, vector<16x128xf32>,
    } else {
    }
    %9 = arith.cmpi eq, %arg2, %arg1 : i32
    %10 = arith.extui %9 : i1 to i32
    %c0_i32_6 = arith.constant 0 : i32
    %11 = arith.cmpi ne, %10, %c0_i32_6 : i32
    scf.if %11 {
      %c0_9 = arith.constant 0 : index
      %c0_10 = arith.constant 0 : index
      %15 = vector.load %arg7[%c0_9, %c0_10] : memref<16x128xf32, #tpu.memory_space<vmem>>, vector<16x128xf32>
      %c0_11 = arith.constant 0 : index
      %c0_12 = arith.constant 0 : index
      %16 = vector.load %arg3[%c0_11, %c0_12] : memref<16x128xbf16, #tpu.memory_space<vmem>>, vector<16x128xbf16>
      %17 = arith.extf %16 : vector<16x128xbf16> to vector<16x128xf32>
      %18 = arith.addf %15, %17 : vector<16x128xf32>
      %c0_13 = arith.constant 0 : index
      %c0_14 = arith.constant 0 : index
      %19 = vector.load %arg7[%c0_13, %c0_14] : memref<16x128xf32, #tpu.memory_space<vmem>>, vector<16x128xf32>
      tpu.vector_store %arg7[%c0_13, %c0_14], %18 {strides = array<i32>} : memref<16x128xf32, #tpu.memory_space<vmem>>, vector<16x128xf32>,
    } else {
    }
    %c0_i32_7 = arith.constant 0 : i32
    %12 = arith.cmpi eq, %arg2, %c0_i32_7 : i32
    %13 = arith.extui %12 : i1 to i32
    %c0_i32_8 = arith.constant 0 : i32
    %14 = arith.cmpi ne, %13, %c0_i32_8 : i32
    scf.if %14 {
      %c0_9 = arith.constant 0 : index
      %c0_10 = arith.constant 0 : index
      %15 = vector.load %arg7[%c0_9, %c0_10] : memref<16x128xf32, #tpu.memory_space<vmem>>, vector<16x128xf32>
      %c0_11 = arith.constant 0 : index
      %c0_12 = arith.constant 0 : index
      %16 = vector.load %arg5[%c0_11, %c0_12] : memref<1x128xbf16, #tpu.memory_space<vmem>>, vector<1x128xbf16>
      %17 = arith.extf %16 : vector<1x128xbf16> to vector<1x128xf32>
      %18 = vector.broadcast %17 : vector<1x128xf32> to vector<16x128xf32>
      %19 = arith.addf %15, %18 : vector<16x128xf32>
      %c0_13 = arith.constant 0 : index
      %c0_14 = arith.constant 0 : index
      %20 = vector.load %arg6[%c0_13, %c0_14] : memref<16x128xf32, #tpu.memory_space<vmem>>, vector<16x128xf32>
      tpu.vector_store %arg6[%c0_13, %c0_14], %19 {strides = array<i32>} : memref<16x128xf32, #tpu.memory_space<vmem>>, vector<16x128xf32>,
    } else {
    }
    return
  }
  func.func @transform_0(%arg0: i32, %arg1: i32, %arg2: i32) -> (i32, i32) {
    %c0_i32 = arith.constant 0 : i32
    return %arg0, %arg2 : i32, i32
  }
  func.func @transform_1(%arg0: i32, %arg1: i32, %arg2: i32) -> (i32, i32) {
    %c0_i32 = arith.constant 0 : i32
    return %arg2, %arg1 : i32, i32
  }
  func.func @transform_2(%arg0: i32, %arg1: i32, %arg2: i32) -> (i32, i32) {
    %c0_i32 = arith.constant 0 : i32
    %c0_i32_0 = arith.constant 0 : i32
    return %c0_i32, %arg1 : i32, i32
  }
  func.func @transform_3(%arg0: i32, %arg1: i32, %arg2: i32) -> (i32, i32) {
    %c0_i32 = arith.constant 0 : i32
    return %arg0, %arg1 : i32, i32
  }
}

</mosaic_0001>

<bundles_post_ra>
// kernel: tpu_custom_call.1
= control target key start
LH: loop header
LB: loop body
LE: loop exit
PB: predicated region body
PF: predicated region fallthrough
CT: control target
= control target key end

     0   :  { %8 = vsyncpa [#allocation4], 0  ;;  %s368_s0 = inlined_call_operand.hbm [shape: bf16[16,128], index: 0, kind: input, shape index: {}]   ;;  %s369_s1 = inlined_call_operand.hbm [shape: bf16[128,128], index: 1, kind: input, shape index: {}]   ;;  %s370_s2 = inlined_call_operand.vmem [shape: bf16[1,128], index: 2, kind: input, shape index: {}]   ;;  %s371_s3 = inlined_call_operand.hbm [shape: f32[16,128], index: 3, kind: output, shape index: {}]  }
   0x1   :  { %9 = vsyncpa [#allocation7], 0 }
   0x2   :  { %10 = vsyncpa [#allocation5], 0  ;;  %s15_s14 = sshll.u32 %s368_s0, 4  ;;  %s329_s15 = smov [#allocation3]   ;;  %s16_s14 = int_to_ptr.hbm [resolvable:$true] %s15_s14 }
   0x3   :  { %s17_s16 = sshll.u32 %s329_s15, 4  ;;  %s28_s19 = sshll.u32 %s369_s1, 4  ;;  %s18_s16 = int_to_ptr.vmem [resolvable:$true] %s17_s16  ;;  %s29_s19 = int_to_ptr.hbm [resolvable:$true] %s28_s19 }
   0x4   :  { %s330_s20 = smov 64   ;;  %s331_s21 = smov 4  }
   0x5   :  { %23 = dma.hbm_to_vmem [thread:$0]  %s16_s14, 128, %s18_s16, [#allocation4], %s330_s20, %s330_s20, %s331_s21  }
   0x6   :  { %s332_s22 = smov [#allocation6]  }
   0x7   :  { %s30_s23 = sshll.u32 %s332_s22, 4  ;;  %s31_s23 = int_to_ptr.vmem [resolvable:$true] %s30_s23 }
   0x8   :  { %36 = dma.hbm_to_vmem [thread:$0]  %s29_s19, 1024, %s31_s23, [#allocation7], %s330_s20, %s330_s20, %s331_s21  }
   0x9   :  { %323 = dma.done.wait [#allocation4], 128  }
   0xa   :  { %324 = vsyncadd [#allocation4], 4294967168 }
   0xb   :  { %325 = dma.done.wait [#allocation7], 1024  }
   0xc   :  { %326 = vsyncadd [#allocation7], 4294966272  ;;  %v239_v0 = vld [vmem:[#allocation6 + $0x38] sm:$0xff]  ;;  %v238_v1 = vld [vmem:[#allocation6 + $0x30] sm:$0xff]  ;;  %s333_s24 = smov [#allocation8]   ;;  %s181_s28 = sshll.u32 %s371_s3, 4  ;;  %s182_s28 = int_to_ptr.hbm [resolvable:$true] %s181_s28 }
   0xd   :  { %119 = vmatpush.bf16.msra.mxu0 %v239_v0  ;;  %v237_v2 = vld [vmem:[#allocation6 + $0x28] sm:$0xff]  ;;  %v236_v3 = vld [vmem:[#allocation6 + $0x20] sm:$0xff]  ;;  %v235_v4 = vld [vmem:[#allocation6 + $0x18] sm:$0xff]  ;;  %s179_s25 = sshll.u32 %s333_s24, 4  ;;  %s335_s29 = smov 8   ;;  %s180_s25 = int_to_ptr.vmem [resolvable:$true] %s179_s25 }
   0xe   :  { %v234_v5 = vld [vmem:[#allocation6 + $0x10] sm:$0xff]  ;;  %v233_v6 = vld [vmem:[#allocation6 + $0x8] sm:$0xff]  ;;  %v232_v7 = vld [vmem:[#allocation6] sm:$0xff] }
   0xf   :  { %v231_v8 = vld [vmem:[#allocation3] sm:$0xff] }
  0x10   :  { %v168_v9 = vld [vmem:[%s370_s2] sm:$0x1]  ;;  %s334_s2 = smov 128  }
  0x11   :  { %120 = vmatpush.bf16.msra.mxu0 %v238_v1  ;;  %v241_v10 = vld [vmem:[#allocation3] sm:$0xff]   ;;  %v169_v11 = vunpack.c.l.bf16 %v168_v9 }
  0x12   :  { %v242_v12 = vunpack.c.l.bf16 %v241_v10  ;;  %v243_v17 = vunpack.c.h.bf16 %v241_v10 }
  0x13   :  { %v170_v13 = vperm.slane %v169_v11, 0 }
  0x15   :  { %121 = vmatpush.bf16.msra.mxu0 %v237_v2 }
  0x19   :  { %122 = vmatpush.bf16.msra.mxu0 %v236_v3 }
  0x1d   :  { %123 = vmatpush.bf16.msra.mxu0 %v235_v4 }
  0x21   :  { %124 = vmatpush.bf16.msra.mxu0 %v234_v5 }
  0x25   :  { %125 = vmatpush.bf16.msra.mxu0 %v233_v6 }
  0x29   :  { %126 = vmatpush.bf16.msra.mxu0 %v232_v7 }
  0x2c   :  { %127 = vmatmul.bf16.vlgmr.msra.gmra.mxu0 %v231_v8 }
  0xa9   :  { %v128_v14 = vpop.f32.mrf.mxu0 }
  0xaa   :  { %v159_v15 = vadd.f32 %v242_v12, %v128_v14 }
  0xac   :  { %v171_v16 = vadd.f32 %v170_v13, %v159_v15 }
  0xae   :  { %173 = vst [vmem:[#allocation8] sm:$0xff] %v171_v16 }
  0xb1   :  { %v130_v18 = vpop.f32.mrf.mxu0 }
  0xb2   :  { %v160_v19 = vadd.f32 %v243_v17, %v130_v18 }
  0xb4   :  { %v172_v20 = vadd.f32 %v170_v13, %v160_v19 }
  0xb6   :  { %174 = vst [vmem:[#allocation8 + $0x8] sm:$0xff] %v172_v20 }
  0xb7   :  { %187 = dma.vmem_to_hbm [thread:$0]  %s180_s25, 256, %s182_s28, [#allocation5], %s334_s2, %s334_s2, %s335_s29  }
  0xb8   :  { %327 = dma.done.wait [#allocation5], 256  }
  0xb9   :  { %328 = vsyncadd [#allocation5], 4294967040 }
  0xba   :  { %192 = vsyncpa [#allocation4], 1 }
  0xbb   :  { %193 = vsyncpa [#allocation7], 1 }
  0xbc   :  { %194 = vsyncpa [#allocation5], 1 }

</bundles_post_ra>
